<compile_context>
chip_gen: v6e
topology: v6e:2x2x1
jax: 0.10.0
libtpu: 0.0.40
codegen_flags: <defaults>
</compile_context>

<pallas_src>
import functools

import jax
import jax.numpy as jnp
from jax.experimental import pallas as pl
from jax.experimental.pallas import tpu as pltpu


def _ffn_kernel(x_ref, w1_ref, b1_ref, w2_ref, b2_ref, o_ref, acc_ref, *, compute_dtype):
    h_idx = pl.program_id(1)
    n_h = pl.num_programs(1)

    @pl.when(h_idx == 0)
    def _():
        acc_ref[...] = jnp.zeros_like(acc_ref)

    # First linear (this H-tile) + bias + ReLU.  Operands arrive pre-cast to compute_dtype;
    # accumulation is f32 on the MXU.
    h = jnp.dot(x_ref[...], w1_ref[...], preferred_element_type=jnp.float32)
    h = h + b1_ref[...]              # (tm, th) + (1, th) broadcast, f32
    h = jnp.maximum(h, 0.0)          # ReLU
    # (Dropout: identity in eval mode.)

    # Second linear: accumulate the partial contraction over the H axis.
    acc_ref[...] += jnp.dot(h.astype(compute_dtype), w2_ref[...],
                            preferred_element_type=jnp.float32)

    @pl.when(h_idx == n_h - 1)
    def _():
        # b2 is added exactly once, in the finalize step.
        o_ref[...] = (acc_ref[...] + b2_ref[...]).astype(o_ref.dtype)
        # (Dropout: identity in eval mode.)


def _vmem_config():
    """Per-generation VMEM budget (tile chooser) and limit (compiler param)."""
    cap = 64 * 1024 * 1024  # conservative default: v7x per-TC capacity
    try:
        info = pltpu.get_tpu_info()
        cap = int(getattr(info, "vmem_capacity_bytes", cap)) or cap
    except Exception:
        pass
    budget = int(cap * 0.65)                       # working-set target for tile search
    limit = min(int(cap * 0.85), 128 * 1024 * 1024)  # compiler scoped-VMEM limit
    return budget, limit


def _tile_bytes(tm, th, D, in_isz, out_isz):
    """Approx VMEM footprint of one pipeline configuration (inputs pre-cast to in_isz)."""
    dbl = 2  # double-buffered pipeline stages
    io_in = dbl * (tm * D + D * th + th * D) * in_isz   # x, W1, W2 tiles
    io_bias = dbl * (th + D) * 4                        # b1, b2 tiles (kept f32)
    io_out = dbl * tm * D * out_isz                     # output tile
    acc = tm * D * 4                                    # f32 accumulator scratch
    inter = tm * th * 4 + tm * th * in_isz              # f32 h + compute-dtype copy
    mxu_scratch = tm * th * 4                           # compiler-internal matmul result
    return io_in + io_bias + io_out + acc + inter + mxu_scratch


def _choose_tiles(M, D, H, in_isz, out_isz, budget):
    # Hidden tile: capped at 512; must divide H.  Shrink if even tm=128 would not fit.
    th = H
    for cand in (512, 256, 128):
        if H % cand == 0:
            th = cand
            break
    while th > 128 and th % 2 == 0 and H % (th // 2) == 0 and \
            _tile_bytes(128, th, D, in_isz, out_isz) > budget:
        th //= 2

    # Row tile: largest candidate (prefer 256-multiples for the 2x256x256 MXUs on v6e/v7x)
    # that fits the budget.  Tiny problems use a single 8-aligned tile.
    if M < 128:
        tm = max(8, ((M + 7) // 8) * 8)
    else:
        m_cap = ((M + 127) // 128) * 128
        tm = 128
        for cand in (1024, 768, 512, 384, 256, 128):
            if cand <= m_cap and _tile_bytes(cand, th, D, in_isz, out_isz) <= budget:
                tm = cand
                break
        # Keep the "parallel" row axis >= 2 tiles so both v7x TensorCores get work.
        if m_cap > 128 and pl.cdiv(M, tm) == 1:
            tm = max(128, ((pl.cdiv(M, 2) + 127) // 128) * 128)
    return tm, th


def feed_forward(x, w1, b1, w2, b2, *, tm=None, th=None, compute_dtype=None):
    """x: (B, S, d_model) -> (B, S, d_model)

    w1: (d_model, 4*d_model), b1: (4*d_model,)
    w2: (4*d_model, d_model), b2: (d_model,)
    compute_dtype: dtype fed to the MXU (accumulation is always f32).  Defaults to
                   bf16 for f32 inputs (native MXU path on v5e/v6e/v7x), else x.dtype.
    """
    B, S, D = x.shape
    H = w1.shape[1]
    M = B * S
    out_dtype = x.dtype

    if compute_dtype is None:
        compute_dtype = jnp.bfloat16 if x.dtype == jnp.float32 else x.dtype
    in_isz = jnp.dtype(compute_dtype).itemsize
    out_isz = jnp.dtype(out_dtype).itemsize

    budget, vmem_limit = _vmem_config()
    auto_tm, auto_th = _choose_tiles(M, D, H, in_isz, out_isz, budget)
    tm = auto_tm if tm is None else tm
    th = auto_th if th is None else th
    assert H % th == 0, "hidden tile must divide 4*d_model"

    # Pad rows to a multiple of tm (padded rows sliced off afterwards).
    n_row_tiles = pl.cdiv(M, tm)
    M_pad = n_row_tiles * tm
    x2 = x.reshape(M, D)
    if M_pad != M:
        x2 = jnp.pad(x2, ((0, M_pad - M), (0, 0)))

    # Cast MXU operands once here so the kernel body never re-casts them.
    x2 = x2.astype(compute_dtype)
    w1c = w1.astype(compute_dtype)
    w2c = w2.astype(compute_dtype)
    b1_2d = b1.reshape(1, H).astype(jnp.float32)
    b2_2d = b2.reshape(1, D).astype(jnp.float32)

    cost = pl.CostEstimate(
        flops=4 * M * D * H,  # two matmuls
        transcendentals=0,
        # x in + out, plus the per-row-tile weight re-stream.
        bytes_accessed=(M * D * in_isz + M * D * out_isz
                        + n_row_tiles * 2 * D * H * in_isz
                        + (H + D) * 4),
    )

    kernel = functools.partial(_ffn_kernel, compute_dtype=compute_dtype)

    out = pl.pallas_call(
        kernel,
        out_shape=jax.ShapeDtypeStruct((M_pad, D), out_dtype),
        grid_spec=pltpu.PrefetchScalarGridSpec(
            num_scalar_prefetch=0,
            grid=(n_row_tiles, H // th),                      # H (reduction) axis last
            in_specs=[
                pl.BlockSpec((tm, D), lambda i, h: (i, 0)),   # x row tile
                pl.BlockSpec((D, th), lambda i, h: (0, h)),   # W1 hidden tile
                pl.BlockSpec((1, th), lambda i, h: (0, h)),   # b1 hidden tile
                pl.BlockSpec((th, D), lambda i, h: (h, 0)),   # W2 hidden tile
                pl.BlockSpec((1, D), lambda i, h: (0, 0)),    # b2
            ],
            out_specs=pl.BlockSpec((tm, D), lambda i, h: (i, 0)),
            scratch_shapes=[pltpu.VMEM((tm, D), jnp.float32)],
        ),
        compiler_params=pltpu.CompilerParams(
            dimension_semantics=("parallel", "arbitrary"),
            vmem_limit_bytes=vmem_limit,
        ),
        cost_estimate=cost,
    )(x2, w1c, b1_2d, w2c, b2_2d)

    if M_pad != M:
        out = out[:M]
    return out.reshape(B, S, D)


def _ref_feed_forward(x, w1, b1, w2, b2):
    h = jnp.maximum(jnp.einsum("bsd,dh->bsh", x, w1) + b1, 0.0)
    return jnp.einsum("bsh,hd->bsd", h, w2) + b2


if __name__ == "__main__":
    # Small shapes consistent with the module: batch=2, seq=8, d_model=32 (hidden=128).
    B, S, D = 2, 8, 32
    H = 4 * D

    key = jax.random.PRNGKey(0)
    kx, kw1, kb1, kw2, kb2 = jax.random.split(key, 5)

    x = jax.random.normal(kx, (B, S, D), dtype=jnp.float32)
    # Deterministic parameter init (mimicking nn.Linear's uniform fan-in scale).
    w1 = jax.random.uniform(kw1, (D, H), jnp.float32, -1.0, 1.0) / jnp.sqrt(D)
    b1 = jax.random.uniform(kb1, (H,), jnp.float32, -1.0, 1.0) / jnp.sqrt(D)
    w2 = jax.random.uniform(kw2, (H, D), jnp.float32, -1.0, 1.0) / jnp.sqrt(H)
    b2 = jax.random.uniform(kb2, (D,), jnp.float32, -1.0, 1.0) / jnp.sqrt(H)

    y = feed_forward(x, w1, b1, w2, b2)   # default path: bf16 MXU operands, f32 accum
    y = jax.block_until_ready(y)

    y_ref = _ref_feed_forward(x, w1, b1, w2, b2)
    assert y.shape == (B, S, D)
    # bf16 operand rounding (f32 accumulation) -> looser tolerance than pure-f32.
    assert jnp.allclose(y, y_ref, atol=2e-2, rtol=2e-2)

    print("KERNEL_OK")
</pallas_src>

<mosaic_0001>
module attributes {stable_mosaic.version = 11 : i64} {
  func.func @_ffn_kernel(%arg0: i32, %arg1: i32, %arg2: memref<16x32xbf16, #tpu.memory_space<vmem>>, %arg3: memref<32x128xbf16, #tpu.memory_space<vmem>>, %arg4: memref<1x128xf32, #tpu.memory_space<vmem>>, %arg5: memref<128x32xbf16, #tpu.memory_space<vmem>>, %arg6: memref<1x32xf32, #tpu.memory_space<vmem>>, %arg7: memref<16x32xf32, #tpu.memory_space<vmem>>, %arg8: memref<16x32xf32, #tpu.memory_space<vmem>>) attributes {dimension_semantics = [#tpu.dimension_semantics<parallel>, #tpu.dimension_semantics<arbitrary>], iteration_bounds = array<i64: 1, 1>, scalar_prefetch = 0 : i64, scratch_operands = 1 : i64, tpu.core_type = #tpu.core_type<tc>, window_params = [{transform_indices = @transform_0, window_bounds = array<i64: 16, 32>}, {transform_indices = @transform_1, window_bounds = array<i64: 32, 128>}, {transform_indices = @transform_2, window_bounds = array<i64: 1, 128>}, {transform_indices = @transform_3, window_bounds = array<i64: 128, 32>}, {pipeline_mode = #tpu.pipeline_mode<synchronous>, transform_indices = @transform_4, window_bounds = array<i64: 1, 32>}, {transform_indices = @transform_5, window_bounds = array<i64: 16, 32>}]} {
    %c0_i32 = arith.constant 0 : i32
    %0 = arith.cmpi eq, %arg1, %c0_i32 : i32
    %1 = arith.extui %0 : i1 to i32
    %c0_i32_0 = arith.constant 0 : i32
    %2 = arith.cmpi ne, %1, %c0_i32_0 : i32
    scf.if %2 {
      %cst_16 = arith.constant 0.000000e+00 : f32
      %20 = vector.broadcast %cst_16 : f32 to vector<16x32xf32>
      %c0_17 = arith.constant 0 : index
      %c0_18 = arith.constant 0 : index
      %21 = vector.load %arg8[%c0_17, %c0_18] : memref<16x32xf32, #tpu.memory_space<vmem>>, vector<16x32xf32>
      tpu.vector_store %arg8[%c0_17, %c0_18], %20 {strides = array<i32>} : memref<16x32xf32, #tpu.memory_space<vmem>>, vector<16x32xf32>,
    } else {
    }
    %c0 = arith.constant 0 : index
    %c0_1 = arith.constant 0 : index
    %3 = vector.load %arg2[%c0, %c0_1] : memref<16x32xbf16, #tpu.memory_space<vmem>>, vector<16x32xbf16>
    %c0_2 = arith.constant 0 : index
    %c0_3 = arith.constant 0 : index
    %4 = vector.load %arg3[%c0_2, %c0_3] : memref<32x128xbf16, #tpu.memory_space<vmem>>, vector<32x128xbf16>
    %cst = arith.constant dense<0.000000e+00> : vector<16x128xf32>
    %5 = tpu.matmul %3, %4, %cst {dimension_numbers = #tpu.dot_dimension_numbers<[1], [0], [0], [1], [0, 0, 1, 1], [], []>} : vector<16x32xbf16>, vector<32x128xbf16>, vector<16x128xf32> -> vector<16x128xf32>
    %c0_4 = arith.constant 0 : index
    %c0_5 = arith.constant 0 : index
    %6 = vector.load %arg4[%c0_4, %c0_5] : memref<1x128xf32, #tpu.memory_space<vmem>>, vector<1x128xf32>
    %7 = vector.broadcast %6 : vector<1x128xf32> to vector<16x128xf32>
    %8 = arith.addf %5, %7 : vector<16x128xf32>
    %cst_6 = arith.constant 0.000000e+00 : f32
    %9 = vector.broadcast %cst_6 : f32 to vector<16x128xf32>
    %10 = arith.maximumf %8, %9 : vector<16x128xf32>
    %c0_7 = arith.constant 0 : index
    %c0_8 = arith.constant 0 : index
    %11 = vector.load %arg8[%c0_7, %c0_8] : memref<16x32xf32, #tpu.memory_space<vmem>>, vector<16x32xf32>
    %12 = arith.truncf %10 : vector<16x128xf32> to vector<16x128xbf16>
    %c0_9 = arith.constant 0 : index
    %c0_10 = arith.constant 0 : index
    %13 = vector.load %arg5[%c0_9, %c0_10] : memref<128x32xbf16, #tpu.memory_space<vmem>>, vector<128x32xbf16>
    %cst_11 = arith.constant dense<0.000000e+00> : vector<16x32xf32>
    %14 = tpu.matmul %12, %13, %cst_11 {dimension_numbers = #tpu.dot_dimension_numbers<[1], [0], [0], [1], [0, 0, 1, 1], [], []>} : vector<16x128xbf16>, vector<128x32xbf16>, vector<16x32xf32> -> vector<16x32xf32>
    %15 = arith.addf %11, %14 : vector<16x32xf32>
    %c0_12 = arith.constant 0 : index
    %c0_13 = arith.constant 0 : index
    %16 = vector.load %arg8[%c0_12, %c0_13] : memref<16x32xf32, #tpu.memory_space<vmem>>, vector<16x32xf32>
    tpu.vector_store %arg8[%c0_12, %c0_13], %15 {strides = array<i32>} : memref<16x32xf32, #tpu.memory_space<vmem>>, vector<16x32xf32>,
    %c0_i32_14 = arith.constant 0 : i32
    %17 = arith.cmpi eq, %arg1, %c0_i32_14 : i32
    %18 = arith.extui %17 : i1 to i32
    %c0_i32_15 = arith.constant 0 : i32
    %19 = arith.cmpi ne, %18, %c0_i32_15 : i32
    scf.if %19 {
      %c0_16 = arith.constant 0 : index
      %c0_17 = arith.constant 0 : index
      %20 = vector.load %arg8[%c0_16, %c0_17] : memref<16x32xf32, #tpu.memory_space<vmem>>, vector<16x32xf32>
      %c0_18 = arith.constant 0 : index
      %c0_19 = arith.constant 0 : index
      %21 = vector.load %arg6[%c0_18, %c0_19] : memref<1x32xf32, #tpu.memory_space<vmem>>, vector<1x32xf32>
      %22 = vector.broadcast %21 : vector<1x32xf32> to vector<16x32xf32>
      %23 = arith.addf %20, %22 : vector<16x32xf32>
      %c0_20 = arith.constant 0 : index
      %c0_21 = arith.constant 0 : index
      %24 = vector.load %arg7[%c0_20, %c0_21] : memref<16x32xf32, #tpu.memory_space<vmem>>, vector<16x32xf32>
      tpu.vector_store %arg7[%c0_20, %c0_21], %23 {strides = array<i32>} : memref<16x32xf32, #tpu.memory_space<vmem>>, vector<16x32xf32>,
    } else {
    }
    return
  }
  func.func @transform_0(%arg0: i32, %arg1: i32) -> (i32, i32) {
    %c0_i32 = arith.constant 0 : i32
    %c0_i32_0 = arith.constant 0 : i32
    return %arg0, %c0_i32 : i32, i32
  }
  func.func @transform_1(%arg0: i32, %arg1: i32) -> (i32, i32) {
    %c0_i32 = arith.constant 0 : i32
    %c0_i32_0 = arith.constant 0 : i32
    return %c0_i32, %arg1 : i32, i32
  }
  func.func @transform_2(%arg0: i32, %arg1: i32) -> (i32, i32) {
    %c0_i32 = arith.constant 0 : i32
    %c0_i32_0 = arith.constant 0 : i32
    return %c0_i32, %arg1 : i32, i32
  }
  func.func @transform_3(%arg0: i32, %arg1: i32) -> (i32, i32) {
    %c0_i32 = arith.constant 0 : i32
    %c0_i32_0 = arith.constant 0 : i32
    return %arg1, %c0_i32 : i32, i32
  }
  func.func @transform_4(%arg0: i32, %arg1: i32) -> (i32, i32) {
    %c0_i32 = arith.constant 0 : i32
    %c0_i32_0 = arith.constant 0 : i32
    %c0_i32_1 = arith.constant 0 : i32
    return %c0_i32, %c0_i32_0 : i32, i32
  }
  func.func @transform_5(%arg0: i32, %arg1: i32) -> (i32, i32) {
    %c0_i32 = arith.constant 0 : i32
    %c0_i32_0 = arith.constant 0 : i32
    return %arg0, %c0_i32 : i32, i32
  }
}

</mosaic_0001>

<bundles_post_ra>
// kernel: tpu_custom_call.1
= control target key start
LH: loop header
LB: loop body
LE: loop exit
PB: predicated region body
PF: predicated region fallthrough
CT: control target
= control target key end

     0   :  { %v342_v1 = vmov 0.0   ;;  %vm343_vm0 = vmmov 0   ;;  %vm26_vm1 = vcmask 261120   ;;  %s426_s0 = inlined_call_operand.vmem [shape: bf16[16,32], index: 0, kind: input, shape index: {}]   ;;  %s427_s1 = inlined_call_operand.vmem [shape: bf16[32,128], index: 1, kind: input, shape index: {}]   ;;  %s428_s2 = inlined_call_operand.vmem [shape: f32[1,128], index: 2, kind: input, shape index: {}]   ;;  %s429_s3 = inlined_call_operand.vmem [shape: bf16[128,32], index: 3, kind: input, shape index: {}]   ;;  %s430_s4 = inlined_call_operand.vmem [shape: f32[1,32], index: 4, kind: input, shape index: {}]   ;;  %s431_s5 = inlined_call_operand.hbm [shape: f32[16,32], index: 5, kind: output, shape index: {}]  }
   0x1   :  { %v309_v0 = vld [vmem:[%s427_s1 + $0x8] sm:$0xff]   ;;  %276 = vmatprep.subr.bf16.mxu0 %v342_v1  ;;  %284 = vmatprep.subr.bf16.mxu1 %v342_v1  ;;  %v310_v2 = vld [vmem:[%s427_s1] sm:$0xff]   ;;  %27 = vst.msk [vmem:[#allocation2] sm:$0xff] %vm26_vm1, %v342_v1  ;;  %28 = vst.msk [vmem:[#allocation2 + $0x8] sm:$0xff] %vm26_vm1, %v342_v1 }
   0x2   :  { %277 = vmatpush3.bf16.msra.mxu0 %v309_v0  ;;  %280 = vmatprep.mubr.msk.bf16.mxu0 %vm343_vm0, %v342_v1  ;;  %v312_v3 = vld [vmem:[%s429_s3 + $0x38] sm:$0xff]   ;;  %v311_v4 = vld [vmem:[%s426_s0] sm:$0xff]   ;;  %v313_v5 = vld [vmem:[%s429_s3 + $0x30] sm:$0xff]  }
   0x3   :  { %278 = vmatprep.subr.bf16.mxu0 %v342_v1  ;;  %300 = vmatprep.mubr.msk.bf16.mxu1 %vm343_vm0, %v342_v1  ;;  %v314_v6 = vld [vmem:[%s429_s3 + $0x28] sm:$0xff]  }
   0x4   :  { %285 = vmatpush3.bf16.msra.mxu1 %v312_v3 }
   0x5   :  { %286 = vmatprep.subr.bf16.mxu1 %v342_v1 }
   0x6   :  { %279 = vmatpush3.bf16.msra.mxu0 %v310_v2 }
   0x8   :  { %287 = vmatpush3.bf16.msra.mxu1 %v313_v5 }
   0x9   :  { %281 = vmatmul.mubr.msk.bf16.vlgmr.msra.gmra.mxu0 %vm26_vm1, %v311_v4  ;;  %288 = vmatprep.subr.bf16.mxu1 %v342_v1 }
   0xa   :  { %10 = vsyncpa [#allocation4], 0  ;;  %v315_v7 = vld [vmem:[%s429_s3 + $0x20] sm:$0xff]   ;;  %v316_v8 = vld [vmem:[%s429_s3 + $0x18] sm:$0xff]   ;;  %s344_s15 = smov [#allocation3]  }
   0xb   :  { %v317_v9 = vld [vmem:[%s429_s3 + $0x10] sm:$0xff]   ;;  %v318_v10 = vld [vmem:[%s429_s3 + $0x8] sm:$0xff]   ;;  %v319_v11 = vld [vmem:[%s429_s3] sm:$0xff]   ;;  %s239_s16 = sshll.u32 %s344_s15, 4  ;;  %s240_s16 = int_to_ptr.vmem [resolvable:$true] %s239_s16 }
   0xc   :  { %289 = vmatpush3.bf16.msra.mxu1 %v314_v6  ;;  %v250_v12 = vld [vmem:[%s428_s2] ss:$0 sm:$0xff]  ;;  %v107_v26 = vld [vmem:[#allocation2 + $0x8] sm:$0xff]  ;;  %s320_s17 = scalar_lea.vmem %s240_s16, 256  ;;  %p325_p1 = scmp.lt.s32.totalorder %s240_s16, %s240_s16 }
   0xd   :  { %290 = vmatprep.subr.bf16.mxu1 %v342_v1  ;;  %v106_v22 = vld [vmem:[#allocation2] sm:$0xff]  ;;  %p321_p0 = scmp.ne.s32.totalorder %s240_s16, %s320_s17  ;;  %p326_p2 = scmp.lt.s32.totalorder %s320_s17, %s320_s17 }
   0xe   :  { %v263_v30 = vld [vmem:[%s430_s4] ss:$0 sm:$0xff] }
   0xf   :  { %p327_p3 = por %p326_p2, %p325_p1 }
  0x10   :  { %291 = vmatpush3.bf16.msra.mxu1 %v315_v7 }
  0x11   :  { %292 = vmatprep.subr.bf16.mxu1 %v342_v1  ;;  %p328_p4 = pnand %p327_p3, %p321_p0 }
  0x14   :  { %293 = vmatpush3.bf16.msra.mxu1 %v316_v8 }
  0x15   :  { %294 = vmatprep.subr.bf16.mxu1 %v342_v1 }
  0x18   :  { %295 = vmatpush3.bf16.msra.mxu1 %v317_v9 }
  0x19   :  { %296 = vmatprep.subr.bf16.mxu1 %v342_v1 }
  0x1c   :  { %297 = vmatpush3.bf16.msra.mxu1 %v318_v10 }
  0x1d   :  { %298 = vmatprep.subr.bf16.mxu1 %v342_v1 }
  0x20   :  { %299 = vmatpush3.bf16.msra.mxu1 %v319_v11 }
  0xc9   :  { %v97_v13 = vpop.f32.mrf.mxu0 }
  0xca   :  { %v98_v15 = vadd.f32 %v250_v12, %v97_v13 }
  0xcb   :  { %v282_v14 = vpop.f32.mrf.mxu0 }
  0xcc   :  { %v104_v19 = vmax.f32 %v98_v15, 0.0 }
  0xcd   :  { %v100_v16 = vpop.f32.mrf.mxu0 }
  0xce   :  { %v101_v17 = vadd.f32 %v250_v12, %v100_v16 }
  0xcf   :  { %v283_v18 = vpop.f32.mrf.mxu0 }
  0xd0   :  { %v105_v20 = vmax.f32 %v101_v17, 0.0 }
  0xd2   :  { %v108_v21 = vpack.c.bf16 %v105_v20, %v104_v19 }
  0xd4   :  { %301 = vmatmul.mubr.bf16.vlgmr.msra.gmra.mxu1 %v108_v21 }
 0x194   :  { %v207_v23 = vpop.f32.mrf.mxu1 }
 0x195   :  { %v214_v24 = vadd.f32 %v207_v23, %v106_v22 }
 0x196   :  { %v302_v25 = vpop.f32.mrf.mxu1 }
 0x197   :  { %216 = vst.msk [vmem:[#allocation2] sm:$0xff] %vm26_vm1, %v214_v24 }
 0x198   :  { %v210_v27 = vpop.f32.mrf.mxu1 }
 0x199   :  { %v215_v28 = vadd.f32 %v210_v27, %v107_v26 }
 0x19a   :  { %v303_v29 = vpop.f32.mrf.mxu1 }
 0x19b   :  { %217 = vst.msk [vmem:[#allocation2 + $0x8] sm:$0xff] %vm26_vm1, %v215_v28 }
 0x19e   :  { %v221_v31 = vld [vmem:[#allocation2] sm:$0xff] }
 0x19f   :  { %v230_v32 = vadd.f32 %v263_v30, %v221_v31 }
 0x1a1   :  { %232 = vst.msk [vmem:[#allocation3] sm:$0xff] %vm26_vm1, %v230_v32 }
 0x1a2   :  { %v222_v33 = vld [vmem:[#allocation2 + $0x8] sm:$0xff] }
 0x1a3   :  { %v231_v34 = vadd.f32 %v263_v30, %v222_v33 }
 0x1a5   :  { %233 = vst.msk [vmem:[#allocation3 + $0x8] sm:$0xff] %vm26_vm1, %v231_v34 }
 0x1a6   :  { %331 = shalt.err (!%p328_p4)
}
 0x1a7   :  { %s345_s18 = smov 128   ;;  %s346_s4 = smov 8  }
 0x1a8   :  { %245 = dma.vmem_to_hbm [thread:$0]  %s240_s16, 256, %s431_s5, [#allocation4], %s345_s18, %s345_s18, %s346_s4  }
 0x1a9   :  { %340 = dma.done.wait [#allocation4], 256  }
 0x1aa   :  { %341 = vsyncadd [#allocation4], 4294967040 }
 0x1ab   :  { %249 = vsyncpa [#allocation4], 1 }

</bundles_post_ra>
